<compile_context>
chip_gen: v7x
topology: tpu7x:2x2x1
jax: 0.10.0
libtpu: 0.0.40
codegen_flags: <defaults>
</compile_context>

<pallas_src>
import functools

import jax
import jax.numpy as jnp
from jax import lax
from jax.experimental import pallas as pl
from jax.experimental.pallas import tpu as pltpu


def residual_kernel(x_ref, m_ref, w3_ref, w1_ref, o_ref, stk_ref, *, W):
    # x_ref:  (Cpad, L)      L = images_per_block * H*W, channels zero-padded to Cpad
    # m_ref:  (9, L)         per-tap boundary masks (1.0 = in-image), grid-resident
    # w3_ref: (Cr, 9*Cpad)   3x3 weights, (ky,kx)-major / channel-minor, Cin->Cpad padded
    # w1_ref: (Cout, Cr)     1x1 weights
    # o_ref:  (Cout, L)
    # stk_ref:(9*Cpad, L)    VMEM scratch holding the stacked shifted taps
    x = x_ref[...]                                  # (Cpad, L)
    cpad, L = x.shape
    cout = o_ref.shape[0]

    # First ReLU (padded channel rows are zero and stay zero).
    h = jnp.maximum(x, 0.0)

    # Build the 9 conv taps: lane-roll by ky*W + kx over the whole block, then
    # multiply by the precomputed in-image mask (zeroes both the conv's implicit
    # zero padding and any roll wrap-around across image boundaries).
    tap_idx = 0
    for ky in (-1, 0, 1):
        for kx in (-1, 0, 1):
            s = ky * W + kx
            t = h if s == 0 else pltpu.roll(h, shift=(-s) % L, axis=1)
            if s != 0:
                t = t * m_ref[pl.ds(tap_idx, 1), :]          # (1, L) bcast over sublanes
            stk_ref[pl.ds(tap_idx * cpad, cpad), :] = t
            tap_idx += 1

    # 3x3 conv as ONE fused MXU contraction over the stacked taps, then 2nd ReLU.
    hid = jnp.dot(w3_ref[...], stk_ref[...], preferred_element_type=jnp.float32)
    hid = jnp.maximum(hid, 0.0)                              # (Cr, L)

    # 1x1 conv + residual add (lane-dense store).
    res = jnp.dot(w1_ref[...], hid, preferred_element_type=jnp.float32)   # (Cout, L)
    o_ref[...] = (x[:cout, :] + res).astype(o_ref.dtype)


def prepare_residual_weights(w3_oihw, w1_oihw):
    """One-time weight relayout (hoist out of the forward path for static weights).

    (Cr, Cin, 3, 3) -> (Cr, ky, kx, Cin) -> pad Cin->Cpad -> (Cr, 9*Cpad);
    (Cout, Cr, 1, 1) -> (Cout, Cr).
    """
    cr, cin = w3_oihw.shape[0], w3_oihw.shape[1]
    cout = w1_oihw.shape[0]
    cpad = -(-cin // 8) * 8
    w3_k = jnp.transpose(w3_oihw, (0, 2, 3, 1))
    w3_k = jnp.pad(w3_k, ((0, 0), (0, 0), (0, 0), (0, cpad - cin)))
    w3_k = w3_k.reshape(cr, 9 * cpad)
    w1_k = w1_oihw.reshape(cout, w1_oihw.shape[1])
    return w3_k, w1_k


def _build_tap_masks(H, W, images_per_block, dtype=jnp.float32):
    """(9, images_per_block*H*W) in-image masks, (ky,kx)-major, built once per shape."""
    hw = H * W
    q = jnp.arange(hw, dtype=jnp.int32)
    row = q // W
    col = q % W
    rows = []
    for ky in (-1, 0, 1):
        for kx in (-1, 0, 1):
            ok = ((row + ky >= 0) & (row + ky <= H - 1) &
                  (col + kx >= 0) & (col + kx <= W - 1))
            rows.append(ok)
    m = jnp.stack(rows, axis=0).astype(dtype)       # (9, H*W)
    return jnp.tile(m, (1, images_per_block))       # (9, L)


def _choose_images_per_block(N, hw, target_lanes=2048):
    """Whole images per lane block: aim for >=~512-2048 lanes, must divide N."""
    nb = max(1, min(N, max(1, target_lanes // hw)))
    while N % nb:
        nb -= 1
    # Last-dim of a partial-extent block must be a multiple of 128.
    if nb != N and (nb * hw) % 128 != 0:
        nb = N
    return nb


def residual_layer_forward(x_nchw, w3_k, w1_k, *, images_per_block=None):
    """x_nchw: (N, Cin, H, W).  w3_k/w1_k: from prepare_residual_weights."""
    N, cin, H, W = x_nchw.shape
    cr = w3_k.shape[0]
    cpad = w3_k.shape[1] // 9
    cout = w1_k.shape[0]
    assert cout == cin, "residual add requires h_dim == in_dim (Cout == Cin)"
    hw = H * W

    nb = images_per_block or _choose_images_per_block(N, hw)
    assert N % nb == 0
    L = nb * hw
    grid = (N // nb,)

    # (N, Cin, H, W) -> (Cin, N*H*W) with channels padded to a full sublane tile.
    # All in-kernel loads/stores are then natively (8, 128)-tile aligned.
    xt = jnp.transpose(x_nchw.reshape(N, cin, hw), (1, 0, 2)).reshape(cin, N * hw)
    xt = jnp.pad(xt, ((0, cpad - cin), (0, 0)))

    # Grid-invariant boundary masks, computed once outside the kernel body.
    masks = _build_tap_masks(H, W, nb, dtype=jnp.float32)

    kernel = functools.partial(residual_kernel, W=W)

    out = pl.pallas_call(
        kernel,
        out_shape=jax.ShapeDtypeStruct((cout, N * hw), x_nchw.dtype),
        grid=grid,
        in_specs=[
            pl.BlockSpec((cpad, L), lambda i: (0, i)),
            pl.BlockSpec((9, L), lambda i: (0, 0)),        # masks stay resident
            pl.BlockSpec((cr, 9 * cpad), lambda i: (0, 0)),  # weights stay resident
            pl.BlockSpec((cout, cr), lambda i: (0, 0)),
        ],
        out_specs=pl.BlockSpec((cout, L), lambda i: (0, i)),
        scratch_shapes=[pltpu.VMEM((9 * cpad, L), jnp.float32)],
        compiler_params=pltpu.CompilerParams(
            dimension_semantics=("parallel",)),   # lane-tile axis; 2 TCs on v7x
    )(xt, masks, w3_k, w1_k)

    # (Cout, N*H*W) -> (N, Cout, H, W)
    return jnp.transpose(out.reshape(cout, N, hw), (1, 0, 2)).reshape(N, cout, H, W)


def residual_layer(x_nchw, w3_oihw, w1_oihw, *, images_per_block=None):
    """Convenience wrapper: weight relayout + forward (prefer hoisting the prep)."""
    w3_k, w1_k = prepare_residual_weights(w3_oihw, w1_oihw)
    return residual_layer_forward(x_nchw, w3_k, w1_k, images_per_block=images_per_block)


def reference_residual_layer(x_nchw, w3_oihw, w1_oihw):
    """Pure-JAX reference matching the PyTorch module (NCHW convs, no bias)."""
    h = jnp.maximum(x_nchw, 0.0)
    h = lax.conv_general_dilated(h, w3_oihw, (1, 1), ((1, 1), (1, 1)),
                                 dimension_numbers=("NCHW", "OIHW", "NCHW"))
    h = jnp.maximum(h, 0.0)
    h = lax.conv_general_dilated(h, w1_oihw, (1, 1), ((0, 0), (0, 0)),
                                 dimension_numbers=("NCHW", "OIHW", "NCHW"))
    return x_nchw + h


if __name__ == "__main__":
    # ResidualLayer(in_dim=4, h_dim=4, res_h_dim=8); residual add requires h_dim == in_dim.
    N, Cin, H, W = 2, 4, 16, 16
    Cr, Cout = 8, Cin

    key = jax.random.PRNGKey(0)
    kx, k3, k1 = jax.random.split(key, 3)
    x = jax.random.normal(kx, (N, Cin, H, W), dtype=jnp.float32)
    w3 = jax.random.normal(k3, (Cr, Cin, 3, 3), dtype=jnp.float32) * 0.1   # torch OIHW
    w1 = jax.random.normal(k1, (Cout, Cr, 1, 1), dtype=jnp.float32) * 0.1  # torch OIHW

    # Weight relayout hoisted out of the forward path (static weights).
    w3_k, w1_k = prepare_residual_weights(w3, w1)

    out = jax.block_until_ready(residual_layer_forward(x, w3_k, w1_k))
    ref = jax.block_until_ready(reference_residual_layer(x, w3, w1))

    assert out.shape == (N, Cin, H, W)
    assert jnp.allclose(out, ref, atol=2e-3, rtol=2e-3), "mismatch vs reference"
    print("KERNEL_OK")
</pallas_src>

<mosaic_0001>
module attributes {stable_mosaic.version = 11 : i64} {
  func.func @residual_kernel(%arg0: i32, %arg1: memref<8x512xf32, #tpu.memory_space<vmem>>, %arg2: memref<9x512xf32, #tpu.memory_space<vmem>>, %arg3: memref<8x72xf32, #tpu.memory_space<vmem>>, %arg4: memref<4x8xf32, #tpu.memory_space<vmem>>, %arg5: memref<4x512xf32, #tpu.memory_space<vmem>>, %arg6: memref<72x512xf32, #tpu.memory_space<vmem>>) attributes {dimension_semantics = [#tpu.dimension_semantics<parallel>], iteration_bounds = array<i64: 1>, scalar_prefetch = 0 : i64, scratch_operands = 1 : i64, tpu.core_type = #tpu.core_type<tc>, window_params = [{transform_indices = @transform_0, window_bounds = array<i64: 8, 512>}, {pipeline_mode = #tpu.pipeline_mode<synchronous>, transform_indices = @transform_1, window_bounds = array<i64: 9, 512>}, {pipeline_mode = #tpu.pipeline_mode<synchronous>, transform_indices = @transform_2, window_bounds = array<i64: 8, 72>}, {pipeline_mode = #tpu.pipeline_mode<synchronous>, transform_indices = @transform_3, window_bounds = array<i64: 4, 8>}, {transform_indices = @transform_4, window_bounds = array<i64: 4, 512>}]} {
    %c0 = arith.constant 0 : index
    %c0_0 = arith.constant 0 : index
    %0 = vector.load %arg1[%c0, %c0_0] : memref<8x512xf32, #tpu.memory_space<vmem>>, vector<8x512xf32>
    %cst = arith.constant 0.000000e+00 : f32
    %1 = vector.broadcast %cst : f32 to vector<8x512xf32>
    %2 = arith.maximumf %0, %1 : vector<8x512xf32>
    %c17_i32 = arith.constant 17 : i32
    %3 = tpu.dynamic_rotate %2 by %c17_i32 dim 1 : vector<8x512xf32>, i32 -> vector<8x512xf32>
    %c0_1 = arith.constant 0 : index
    %c0_2 = arith.constant 0 : index
    %4 = vector.load %arg2[%c0_1, %c0_2] : memref<9x512xf32, #tpu.memory_space<vmem>>, vector<1x512xf32>
    %5 = vector.broadcast %4 : vector<1x512xf32> to vector<8x512xf32>
    %6 = arith.mulf %3, %5 : vector<8x512xf32>
    %c0_3 = arith.constant 0 : index
    %c0_4 = arith.constant 0 : index
    %7 = vector.load %arg6[%c0_3, %c0_4] : memref<72x512xf32, #tpu.memory_space<vmem>>, vector<8x512xf32>
    tpu.vector_store %arg6[%c0_3, %c0_4], %6 {strides = array<i32>} : memref<72x512xf32, #tpu.memory_space<vmem>>, vector<8x512xf32>,
    %c16_i32 = arith.constant 16 : i32
    %8 = tpu.dynamic_rotate %2 by %c16_i32 dim 1 : vector<8x512xf32>, i32 -> vector<8x512xf32>
    %c1 = arith.constant 1 : index
    %c0_5 = arith.constant 0 : index
    %9 = vector.load %arg2[%c1, %c0_5] : memref<9x512xf32, #tpu.memory_space<vmem>>, vector<1x512xf32>
    %10 = vector.broadcast %9 : vector<1x512xf32> to vector<8x512xf32>
    %11 = arith.mulf %8, %10 : vector<8x512xf32>
    %c8 = arith.constant 8 : index
    %c0_6 = arith.constant 0 : index
    %12 = vector.load %arg6[%c8, %c0_6] : memref<72x512xf32, #tpu.memory_space<vmem>>, vector<8x512xf32>
    tpu.vector_store %arg6[%c8, %c0_6], %11 {strides = array<i32>} : memref<72x512xf32, #tpu.memory_space<vmem>>, vector<8x512xf32>,
    %c15_i32 = arith.constant 15 : i32
    %13 = tpu.dynamic_rotate %2 by %c15_i32 dim 1 : vector<8x512xf32>, i32 -> vector<8x512xf32>
    %c2 = arith.constant 2 : index
    %c0_7 = arith.constant 0 : index
    %14 = vector.load %arg2[%c2, %c0_7] : memref<9x512xf32, #tpu.memory_space<vmem>>, vector<1x512xf32>
    %15 = vector.broadcast %14 : vector<1x512xf32> to vector<8x512xf32>
    %16 = arith.mulf %13, %15 : vector<8x512xf32>
    %c16 = arith.constant 16 : index
    %c0_8 = arith.constant 0 : index
    %17 = vector.load %arg6[%c16, %c0_8] : memref<72x512xf32, #tpu.memory_space<vmem>>, vector<8x512xf32>
    tpu.vector_store %arg6[%c16, %c0_8], %16 {strides = array<i32>} : memref<72x512xf32, #tpu.memory_space<vmem>>, vector<8x512xf32>,
    %c1_i32 = arith.constant 1 : i32
    %18 = tpu.dynamic_rotate %2 by %c1_i32 dim 1 : vector<8x512xf32>, i32 -> vector<8x512xf32>
    %c3 = arith.constant 3 : index
    %c0_9 = arith.constant 0 : index
    %19 = vector.load %arg2[%c3, %c0_9] : memref<9x512xf32, #tpu.memory_space<vmem>>, vector<1x512xf32>
    %20 = vector.broadcast %19 : vector<1x512xf32> to vector<8x512xf32>
    %21 = arith.mulf %18, %20 : vector<8x512xf32>
    %c24 = arith.constant 24 : index
    %c0_10 = arith.constant 0 : index
    %22 = vector.load %arg6[%c24, %c0_10] : memref<72x512xf32, #tpu.memory_space<vmem>>, vector<8x512xf32>
    tpu.vector_store %arg6[%c24, %c0_10], %21 {strides = array<i32>} : memref<72x512xf32, #tpu.memory_space<vmem>>, vector<8x512xf32>,
    %c32 = arith.constant 32 : index
    %c0_11 = arith.constant 0 : index
    %23 = vector.load %arg6[%c32, %c0_11] : memref<72x512xf32, #tpu.memory_space<vmem>>, vector<8x512xf32>
    tpu.vector_store %arg6[%c32, %c0_11], %2 {strides = array<i32>} : memref<72x512xf32, #tpu.memory_space<vmem>>, vector<8x512xf32>,
    %c511_i32 = arith.constant 511 : i32
    %24 = tpu.dynamic_rotate %2 by %c511_i32 dim 1 : vector<8x512xf32>, i32 -> vector<8x512xf32>
    %c5 = arith.constant 5 : index
    %c0_12 = arith.constant 0 : index
    %25 = vector.load %arg2[%c5, %c0_12] : memref<9x512xf32, #tpu.memory_space<vmem>>, vector<1x512xf32>
    %26 = vector.broadcast %25 : vector<1x512xf32> to vector<8x512xf32>
    %27 = arith.mulf %24, %26 : vector<8x512xf32>
    %c40 = arith.constant 40 : index
    %c0_13 = arith.constant 0 : index
    %28 = vector.load %arg6[%c40, %c0_13] : memref<72x512xf32, #tpu.memory_space<vmem>>, vector<8x512xf32>
    tpu.vector_store %arg6[%c40, %c0_13], %27 {strides = array<i32>} : memref<72x512xf32, #tpu.memory_space<vmem>>, vector<8x512xf32>,
    %c497_i32 = arith.constant 497 : i32
    %29 = tpu.dynamic_rotate %2 by %c497_i32 dim 1 : vector<8x512xf32>, i32 -> vector<8x512xf32>
    %c6 = arith.constant 6 : index
    %c0_14 = arith.constant 0 : index
    %30 = vector.load %arg2[%c6, %c0_14] : memref<9x512xf32, #tpu.memory_space<vmem>>, vector<1x512xf32>
    %31 = vector.broadcast %30 : vector<1x512xf32> to vector<8x512xf32>
    %32 = arith.mulf %29, %31 : vector<8x512xf32>
    %c48 = arith.constant 48 : index
    %c0_15 = arith.constant 0 : index
    %33 = vector.load %arg6[%c48, %c0_15] : memref<72x512xf32, #tpu.memory_space<vmem>>, vector<8x512xf32>
    tpu.vector_store %arg6[%c48, %c0_15], %32 {strides = array<i32>} : memref<72x512xf32, #tpu.memory_space<vmem>>, vector<8x512xf32>,
    %c496_i32 = arith.constant 496 : i32
    %34 = tpu.dynamic_rotate %2 by %c496_i32 dim 1 : vector<8x512xf32>, i32 -> vector<8x512xf32>
    %c7 = arith.constant 7 : index
    %c0_16 = arith.constant 0 : index
    %35 = vector.load %arg2[%c7, %c0_16] : memref<9x512xf32, #tpu.memory_space<vmem>>, vector<1x512xf32>
    %36 = vector.broadcast %35 : vector<1x512xf32> to vector<8x512xf32>
    %37 = arith.mulf %34, %36 : vector<8x512xf32>
    %c56 = arith.constant 56 : index
    %c0_17 = arith.constant 0 : index
    %38 = vector.load %arg6[%c56, %c0_17] : memref<72x512xf32, #tpu.memory_space<vmem>>, vector<8x512xf32>
    tpu.vector_store %arg6[%c56, %c0_17], %37 {strides = array<i32>} : memref<72x512xf32, #tpu.memory_space<vmem>>, vector<8x512xf32>,
    %c495_i32 = arith.constant 495 : i32
    %39 = tpu.dynamic_rotate %2 by %c495_i32 dim 1 : vector<8x512xf32>, i32 -> vector<8x512xf32>
    %c8_18 = arith.constant 8 : index
    %c0_19 = arith.constant 0 : index
    %40 = vector.load %arg2[%c8_18, %c0_19] : memref<9x512xf32, #tpu.memory_space<vmem>>, vector<1x512xf32>
    %41 = vector.broadcast %40 : vector<1x512xf32> to vector<8x512xf32>
    %42 = arith.mulf %39, %41 : vector<8x512xf32>
    %c64 = arith.constant 64 : index
    %c0_20 = arith.constant 0 : index
    %43 = vector.load %arg6[%c64, %c0_20] : memref<72x512xf32, #tpu.memory_space<vmem>>, vector<8x512xf32>
    tpu.vector_store %arg6[%c64, %c0_20], %42 {strides = array<i32>} : memref<72x512xf32, #tpu.memory_space<vmem>>, vector<8x512xf32>,
    %c0_21 = arith.constant 0 : index
    %c0_22 = arith.constant 0 : index
    %44 = vector.load %arg3[%c0_21, %c0_22] : memref<8x72xf32, #tpu.memory_space<vmem>>, vector<8x72xf32>
    %c0_23 = arith.constant 0 : index
    %c0_24 = arith.constant 0 : index
    %45 = vector.load %arg6[%c0_23, %c0_24] : memref<72x512xf32, #tpu.memory_space<vmem>>, vector<72x512xf32>
    %cst_25 = arith.constant dense<0.000000e+00> : vector<8x512xf32>
    %46 = tpu.matmul %44, %45, %cst_25 {dimension_numbers = #tpu.dot_dimension_numbers<[1], [0], [0], [1], [0, 0, 1, 1], [], []>} : vector<8x72xf32>, vector<72x512xf32>, vector<8x512xf32> -> vector<8x512xf32>
    %cst_26 = arith.constant 0.000000e+00 : f32
    %47 = vector.broadcast %cst_26 : f32 to vector<8x512xf32>
    %48 = arith.maximumf %46, %47 : vector<8x512xf32>
    %c0_27 = arith.constant 0 : index
    %c0_28 = arith.constant 0 : index
    %49 = vector.load %arg4[%c0_27, %c0_28] : memref<4x8xf32, #tpu.memory_space<vmem>>, vector<4x8xf32>
    %cst_29 = arith.constant dense<0.000000e+00> : vector<4x512xf32>
    %50 = tpu.matmul %49, %48, %cst_29 {dimension_numbers = #tpu.dot_dimension_numbers<[1], [0], [0], [1], [0, 0, 1, 1], [], []>} : vector<4x8xf32>, vector<8x512xf32>, vector<4x512xf32> -> vector<4x512xf32>
    %51 = vector.extract_strided_slice %0 {offsets = [0, 0], sizes = [4, 512], strides = [1, 1]} : vector<8x512xf32> to vector<4x512xf32>
    %52 = arith.addf %51, %50 : vector<4x512xf32>
    %c0_30 = arith.constant 0 : index
    %c0_31 = arith.constant 0 : index
    %53 = vector.load %arg5[%c0_30, %c0_31] : memref<4x512xf32, #tpu.memory_space<vmem>>, vector<4x512xf32>
    tpu.vector_store %arg5[%c0_30, %c0_31], %52 {strides = array<i32>} : memref<4x512xf32, #tpu.memory_space<vmem>>, vector<4x512xf32>,
    return
  }
  func.func @transform_0(%arg0: i32) -> (i32, i32) {
    %c0_i32 = arith.constant 0 : i32
    %c0_i32_0 = arith.constant 0 : i32
    return %c0_i32, %arg0 : i32, i32
  }
  func.func @transform_1(%arg0: i32) -> (i32, i32) {
    %c0_i32 = arith.constant 0 : i32
    %c0_i32_0 = arith.constant 0 : i32
    %c0_i32_1 = arith.constant 0 : i32
    return %c0_i32, %c0_i32_0 : i32, i32
  }
  func.func @transform_2(%arg0: i32) -> (i32, i32) {
    %c0_i32 = arith.constant 0 : i32
    %c0_i32_0 = arith.constant 0 : i32
    %c0_i32_1 = arith.constant 0 : i32
    return %c0_i32, %c0_i32_0 : i32, i32
  }
  func.func @transform_3(%arg0: i32) -> (i32, i32) {
    %c0_i32 = arith.constant 0 : i32
    %c0_i32_0 = arith.constant 0 : i32
    %c0_i32_1 = arith.constant 0 : i32
    return %c0_i32, %c0_i32_0 : i32, i32
  }
  func.func @transform_4(%arg0: i32) -> (i32, i32) {
    %c0_i32 = arith.constant 0 : i32
    %c0_i32_0 = arith.constant 0 : i32
    return %c0_i32, %arg0 : i32, i32
  }
}

</mosaic_0001>

<bundles_post_ra>
// kernel: tpu_custom_call.1
= control target key start
LH: loop header
LB: loop body
LE: loop exit
PB: predicated region body
PF: predicated region fallthrough
CT: control target
= control target key end

     0   :  { %9 = vsyncpa [#allocation4], 0  ;;  %s1182_s0 = inlined_call_operand.hbm [shape: f32[8,512], index: 0, kind: input, shape index: {}]   ;;  %s1183_s1 = inlined_call_operand.hbm [shape: f32[9,512], index: 1, kind: input, shape index: {}]   ;;  %s1184_s2 = inlined_call_operand.hbm [shape: f32[8,72], index: 2, kind: input, shape index: {}]   ;;  %s1185_s3 = inlined_call_operand.vmem [shape: f32[4,8], index: 3, kind: input, shape index: {}]   ;;  %s1186_s4 = inlined_call_operand.hbm [shape: f32[4,512], index: 4, kind: output, shape index: {}]  }
   0x1   :  { %10 = vsyncpa [#allocation7], 0 }
   0x2   :  { %11 = vsyncpa [#allocation5], 0  ;;  %s929_s15 = smov [#allocation6]   ;;  %s835_s19 = scalar_lea.hbm %s1183_s1, 1024 }
   0x3   :  { %s27_s16 = sshll.u32 %s929_s15, 4  ;;  %p836_p0 = scmp.ne.s32.totalorder %s1183_s1, %s835_s19  ;;  %s28_s16 = int_to_ptr.vmem [resolvable:$true] %s27_s16 }
   0x4   :  { %p839_p1 = scmp.lt.u32.totalorder %s835_s19, %s1183_s1 }
   0x6   :  { %p841_p2 = pnand %p839_p1, %p836_p0 }
   0x8   :  { %844 = shalt.err (!%p841_p2)
}
   0x9   :  { %s845_s24 = scalar_lea.vmem %s28_s16, 1024  ;;  %p850_p4 = scmp.lt.s32.totalorder %s28_s16, %s28_s16 }
   0xa   :  { %p846_p3 = scmp.ne.s32.totalorder %s28_s16, %s845_s24  ;;  %p851_p5 = scmp.lt.s32.totalorder %s845_s24, %s845_s24 }
   0xc   :  { %p852_p6 = por %p851_p5, %p850_p4 }
   0xe   :  { %p853_p7 = pnand %p852_p6, %p846_p3 }
  0x10   :  { %856 = shalt.err (!%p853_p7)
}
  0x11   :  { %s930_s25 = smov 512   ;;  %s931_s26 = smov 32  }
  0x12   :  { %33 = dma.hbm_to_vmem [thread:$0]  %s1183_s1, 1024, %s28_s16, [#allocation7], %s930_s25, %s930_s25, %s931_s26  }
  0x13   :  { %s932_s29 = smov [#allocation3]   ;;  %s933_s5 = smov [#allocation8]  }
  0x14   :  { %s18_s30 = sshll.u32 %s932_s29, 4  ;;  %s40_s6 = sshll.u32 %s933_s5, 4  ;;  %s19_s30 = int_to_ptr.vmem [resolvable:$true] %s18_s30  ;;  %s41_s6 = int_to_ptr.vmem [resolvable:$true] %s40_s6 }
  0x15   :  { %s857_s9 = scalar_lea.hbm %s1182_s0, 512 }
  0x16   :  { %p858_p8 = scmp.ne.s32.totalorder %s1182_s0, %s857_s9  ;;  %p861_p9 = scmp.lt.u32.totalorder %s857_s9, %s1182_s0 }
  0x18   :  { %p863_p10 = pnand %p861_p9, %p858_p8 }
  0x1a   :  { %866 = shalt.err (!%p863_p10)
}
  0x1b   :  { %s867_s1 = scalar_lea.vmem %s19_s30, 512  ;;  %p872_p12 = scmp.lt.s32.totalorder %s19_s30, %s19_s30 }
  0x1c   :  { %p868_p11 = scmp.ne.s32.totalorder %s19_s30, %s867_s1  ;;  %p873_p13 = scmp.lt.s32.totalorder %s867_s1, %s867_s1 }
  0x1e   :  { %p874_p0 = por %p873_p13, %p872_p12 }
  0x20   :  { %p875_p1 = pnand %p874_p0, %p868_p11 }
  0x22   :  { %878 = shalt.err (!%p875_p1)
}
  0x23   :  { %21 = dma.hbm_to_vmem [thread:$0]  %s1182_s0, 512, %s19_s30, [#allocation4]  }
  0x24   :  { %s879_s18 = scalar_lea.hbm %s1184_s2, 128 }
  0x25   :  { %p880_p2 = scmp.ne.s32.totalorder %s1184_s2, %s879_s18  ;;  %p883_p3 = scmp.lt.u32.totalorder %s879_s18, %s1184_s2 }
  0x27   :  { %p885_p4 = pnand %p883_p3, %p880_p2 }
  0x29   :  { %888 = shalt.err (!%p885_p4)
}
  0x2a   :  { %s889_s23 = scalar_lea.vmem %s41_s6, 128  ;;  %p894_p6 = scmp.lt.s32.totalorder %s41_s6, %s41_s6 }
  0x2b   :  { %p890_p5 = scmp.ne.s32.totalorder %s41_s6, %s889_s23  ;;  %p895_p7 = scmp.lt.s32.totalorder %s889_s23, %s889_s23 }
  0x2d   :  { %p896_p8 = por %p895_p7, %p894_p6 }
  0x2f   :  { %p897_p9 = pnand %p896_p8, %p890_p5 }
  0x31   :  { %900 = shalt.err (!%p897_p9)
}
  0x32   :  { %43 = dma.hbm_to_vmem [thread:$0]  %s1184_s2, 128, %s41_s6, [#allocation7]  }
  0x33   :  { %923 = dma.done.wait [#allocation4], 512  }
  0x34   :  { %924 = vsyncadd [#allocation4], 4294966784 }
  0x35   :  { %925 = dma.done.wait [#allocation7], 1152  }
  0x36   :  { %926 = vsyncadd [#allocation7], 4294966144  ;;  %v1005_v0 = vld [vmem:[#allocation3 + $0x10] sm:$0xff]  ;;  %v1007_v1 = vld [vmem:[#allocation3] sm:$0xff]  ;;  %s934_s25 = smov 17   ;;  %s935_s2 = smov 16   ;;  %v71_v9 = vlaneseq }
  0x37   :  { %v1009_v2 = vld [vmem:[#allocation3 + $0x18] sm:$0xff]  ;;  %v1012_v3 = vmax.f32 %v1005_v0, 0.0  ;;  %v1015_v4 = vmax.f32 %v1007_v1, 0.0  ;;  %v1017_v5 = vld [vmem:[#allocation3 + $0x8] sm:$0xff]  ;;  %s936_s26 = smov 15   ;;  %s937_s27 = smov 1  }
  0x38   :  { %v1022_v6 = vmax.f32 %v1009_v2, 0.0  ;;  %v1025_v7 = vmax.f32 %v1017_v5, 0.0  ;;  %s938_s28 = smov 127   ;;  %s939_s29 = smov 113   ;;  %v941_v8 = vmov 0.0   ;;  %v81_v10 = vshrl.u32 %v71_v9, 7 }
  0x39   :  { %67 = vrot.lane.b32.xlu1 %v1012_v3, %s934_s25  ;;  %63 = vrot.lane.b32.xlu0 %v1015_v4, %s934_s25  ;;  %s940_s30 = smov 112   ;;  %s942_s5 = smov 111   ;;  %v1059_v13 = vand.u32 127, %v71_v9  ;;  %v78_v15 = vld [vmem:[#allocation6] ss:$8 sm:$0xf] }
  0x3a   :  { %525 = vmatprep.mubr.f32.mxu0 %v941_v8  ;;  %596 = vmatprep.mubr.f32.mxu1 %v941_v8  ;;  %v1061_v14 = vsub.s32 1, %v81_v10  ;;  %v122_v16 = vld [vmem:[#allocation6 + $0x1] ss:$8 sm:$0xf]  ;;  %v1064_v17 = vsub.s32 0, %v81_v10  ;;  %v1066_v19 = vsub.s32 2, %v81_v10 }
  0x3b   :  { %vm73_vm0 = vcmp.lt.s32.totalorder %v1059_v13, 17  ;;  %v1068_v21 = vsub.s32 3, %v81_v10  ;;  %vm116_vm1 = vcmp.lt.s32.totalorder %v1059_v13, 16  ;;  %v166_v56 = vld [vmem:[#allocation6 + $0x2] ss:$8 sm:$0xf] }
  0x3c   :  { %v87_v22 = vrot.slane %v78_v15, %v1061_v14  ;;  %v131_v23 = vrot.slane %v122_v16, %v1061_v14  ;;  %v83_v25 = vrot.slane %v78_v15, %v1064_v17  ;;  %v91_v26 = vrot.slane %v78_v15, %v1066_v19  ;;  %v210_v57 = vld [vmem:[#allocation6 + $0x3] ss:$8 sm:$0xf]  ;;  %s943_s8 = smov [#allocation9]  }
  0x3d   :  { %69 = vrot.lane.b32.xlu1 %v1022_v6, %s934_s25  ;;  %65 = vrot.lane.b32.xlu0 %v1025_v7, %s934_s25  ;;  %v127_v29 = vrot.slane %v122_v16, %v1064_v17  ;;  %v135_v32 = vrot.slane %v122_v16, %v1066_v19  ;;  %v95_v33 = vrot.slane %v78_v15, %v1068_v21  ;;  %vm160_vm2 = vcmp.lt.s32.totalorder %v1059_v13, 15  ;;  %s774_s9 = sshll.u32 %s943_s8, 4  ;;  %s775_s9 = int_to_ptr.vmem [resolvable:$true] %s774_s9 }
  0x3e   :  { %v139_v37 = vrot.slane %v122_v16, %v1068_v21  ;;  %v175_v60 = vrot.slane %v166_v56, %v1061_v14  ;;  %vm204_vm3 = vcmp.lt.s32.totalorder %v1059_v13, 1  ;;  %v219_v61 = vrot.slane %v210_v57, %v1061_v14  ;;  %p906_p11 = scmp.lt.s32.totalorder %s775_s9, %s775_s9 }
  0x3f   :  { %v171_v63 = vrot.slane %v166_v56, %v1064_v17  ;;  %v179_v9 = vrot.slane %v166_v56, %v1066_v19  ;;  %v183_v10 = vrot.slane %v166_v56, %v1068_v21  ;;  %vm252_vm4 = vcmp.lt.s32.totalorder %v1059_v13, 127 }
  0x40   :  { %vm340_vm5 = vcmp.lt.s32.totalorder %v1059_v13, 112  ;;  %vm296_vm6 = vcmp.lt.s32.totalorder %v1059_v13, 113  ;;  %vm384_vm7 = vcmp.lt.s32.totalorder %v1059_v13, 111  ;;  %vm457_vm8 = vcmask 588800  }
  0x41   :  { %110 = vrot.lane.b32.xlu1 %v1025_v7, %s935_s2  ;;  %108 = vrot.lane.b32.xlu0 %v1015_v4, %s935_s2  ;;  %vm608_vm9 = vcmask 64512  }
  0x45   :  { %114 = vrot.lane.b32.xlu1 %v1022_v6, %s935_s2  ;;  %112 = vrot.lane.b32.xlu0 %v1012_v3, %s935_s2 }
  0x49   :  { %154 = vrot.lane.b32.xlu1 %v1025_v7, %s936_s26  ;;  %152 = vrot.lane.b32.xlu0 %v1015_v4, %s936_s26 }
  0x4d   :  { %158 = vrot.lane.b32.xlu1 %v1022_v6, %s936_s26  ;;  %156 = vrot.lane.b32.xlu0 %v1012_v3, %s936_s26 }
  0x51   :  { %198 = vrot.lane.b32.xlu1 %v1025_v7, %s937_s27  ;;  %196 = vrot.lane.b32.xlu0 %v1015_v4, %s937_s27 }
  0x55   :  { %202 = vrot.lane.b32.xlu1 %v1022_v6, %s937_s27  ;;  %200 = vrot.lane.b32.xlu0 %v1012_v3, %s937_s27 }
  0x59   :  { %246 = vrot.lane.b32.xlu1 %v1025_v7, %s938_s28  ;;  %244 = vrot.lane.b32.xlu0 %v1015_v4, %s938_s28 }
  0x5d   :  { %250 = vrot.lane.b32.xlu1 %v1022_v6, %s938_s28  ;;  %248 = vrot.lane.b32.xlu0 %v1012_v3, %s938_s28 }
  0x61   :  { %290 = vrot.lane.b32.xlu1 %v1025_v7, %s939_s29  ;;  %288 = vrot.lane.b32.xlu0 %v1015_v4, %s939_s29 }
  0x65   :  { %294 = vrot.lane.b32.xlu1 %v1022_v6, %s939_s29  ;;  %292 = vrot.lane.b32.xlu0 %v1012_v3, %s939_s29 }
  0x69   :  { %334 = vrot.lane.b32.xlu1 %v1025_v7, %s940_s30  ;;  %332 = vrot.lane.b32.xlu0 %v1015_v4, %s940_s30 }
  0x6d   :  { %338 = vrot.lane.b32.xlu1 %v1022_v6, %s940_s30  ;;  %336 = vrot.lane.b32.xlu0 %v1012_v3, %s940_s30 }
  0x71   :  { %378 = vrot.lane.b32.xlu1 %v1025_v7, %s942_s5  ;;  %376 = vrot.lane.b32.xlu0 %v1015_v4, %s942_s5 }
  0x75   :  { %382 = vrot.lane.b32.xlu1 %v1022_v6, %s942_s5  ;;  %380 = vrot.lane.b32.xlu0 %v1012_v3, %s942_s5 }
  0xab   :  { %v68_v11 = vpop.permute.xlu1 %67  ;;  %v64_v12 = vpop.permute.xlu0 %63 }
  0xaf   :  { %v70_v18 = vpop.permute.xlu1 %69  ;;  %v66_v20 = vpop.permute.xlu0 %65 }
  0xb0   :  { %v76_v24 = vsel %vm73_vm0, %v64_v12, %v66_v20  ;;  %v77_v30 = vsel %vm73_vm0, %v70_v18, %v64_v12  ;;  %v75_v34 = vsel %vm73_vm0, %v66_v20, %v68_v11  ;;  %v74_v38 = vsel %vm73_vm0, %v68_v11, %v70_v18 }
  0xb1   :  { %v101_v35 = vmul.f32 %v87_v22, %v76_v24  ;;  %v100_v39 = vmul.f32 %v83_v25, %v77_v30  ;;  %v102_v43 = vmul.f32 %v91_v26, %v75_v34  ;;  %v103_v49 = vmul.f32 %v95_v33, %v74_v38 }
  0xb2   :  { %v215_v18 = vrot.slane %v210_v57, %v1064_v17  ;;  %v223_v20 = vrot.slane %v210_v57, %v1066_v19  ;;  %v227_v25 = vrot.slane %v210_v57, %v1068_v21 }
  0xb3   :  { %v111_v27 = vpop.permute.xlu1 %110  ;;  %v109_v28 = vpop.permute.xlu0 %108 }
  0xb4   :  { %v119_v31 = vsel %vm116_vm1, %v109_v28, %v111_v27 }
  0xb5   :  { %v145_v36 = vmul.f32 %v131_v23, %v119_v31 }
  0xb7   :  { %v115_v40 = vpop.permute.xlu1 %114  ;;  %v113_v41 = vpop.permute.xlu0 %112  ;;  %v788_v42 = vpack.c.bf16 %v145_v36, %v101_v35 }
  0xb8   :  { %v120_v44 = vsel %vm116_vm1, %v115_v40, %v109_v28  ;;  %v117_v45 = vsel %vm116_vm1, %v113_v41, %v115_v40  ;;  %v118_v46 = vsel %vm116_vm1, %v111_v27, %v113_v41 }
  0xb9   :  { %v144_v47 = vmul.f32 %v127_v29, %v120_v44  ;;  %v146_v48 = vmul.f32 %v135_v32, %v118_v46  ;;  %789 = vmatprep.subr.bf16.mxu0 %v788_v42  ;;  %v147_v50 = vmul.f32 %v139_v37, %v117_v45 }
  0xbb   :  { %v155_v51 = vpop.permute.xlu1 %154  ;;  %v153_v52 = vpop.permute.xlu0 %152  ;;  %v790_v53 = vpack.c.bf16 %v144_v47, %v100_v39  ;;  %v804_v54 = vpack.c.bf16 %v147_v50, %v103_v49  ;;  %v806_v55 = vpack.c.bf16 %v146_v48, %v102_v43  ;;  %v258_v39 = vld [vmem:[#allocation6 + $0x5] ss:$8 sm:$0xf] }
  0xbc   :  { %v163_v62 = vsel %vm160_vm2, %v153_v52, %v155_v51  ;;  %v263_v45 = vrot.slane %v258_v39, %v1064_v17  ;;  %v275_v46 = vrot.slane %v258_v39, %v1068_v21  ;;  %v267_v48 = vrot.slane %v258_v39, %v1061_v14 }
  0xbd   :  { %791 = vmatpush1.bf16.msra.mxu0 %v790_v53  ;;  %805 = vmatprep.subr.bf16.mxu1 %v804_v54  ;;  %v189_v22 = vmul.f32 %v175_v60, %v163_v62  ;;  %v271_v49 = vrot.slane %v258_v39, %v1066_v19 }
  0xbe   :  { %807 = vmatpush1.bf16.msra.mxu1 %v806_v55 }
  0xbf   :  { %v159_v58 = vpop.permute.xlu1 %158  ;;  %v157_v59 = vpop.permute.xlu0 %156 }
  0xc0   :  { %v164_v15 = vsel %vm160_vm2, %v159_v58, %v153_v52  ;;  %v162_v23 = vsel %vm160_vm2, %v155_v51, %v157_v59  ;;  %v161_v26 = vsel %vm160_vm2, %v157_v59, %v159_v58 }
  0xc1   :  { %v188_v27 = vmul.f32 %v171_v63, %v164_v15  ;;  %v190_v31 = vmul.f32 %v179_v9, %v162_v23  ;;  %v191_v35 = vmul.f32 %v183_v10, %v161_v26  ;;  %v302_v15 = vld [vmem:[#allocation6 + $0x6] ss:$8 sm:$0xf] }
  0xc3   :  { %v199_v11 = vpop.permute.xlu1 %198  ;;  %v197_v12 = vpop.permute.xlu0 %196 }
  0xc4   :  { %v207_v16 = vsel %vm204_vm3, %v197_v12, %v199_v11 }
  0xc5   :  { %v233_v24 = vmul.f32 %v219_v61, %v207_v16 }
  0xc7   :  { %v203_v28 = vpop.permute.xlu1 %202  ;;  %v201_v29 = vpop.permute.xlu0 %200  ;;  %v792_v30 = vpack.c.bf16 %v233_v24, %v189_v22 }
  0xc8   :  { %v208_v32 = vsel %vm204_vm3, %v203_v28, %v197_v12  ;;  %v205_v33 = vsel %vm204_vm3, %v201_v29, %v203_v28  ;;  %v206_v34 = vsel %vm204_vm3, %v199_v11, %v201_v29  ;;  %v346_v12 = vld [vmem:[#allocation6 + $0x7] ss:$8 sm:$0xf] }
  0xc9   :  { %v232_v36 = vmul.f32 %v215_v18, %v208_v32  ;;  %v234_v37 = vmul.f32 %v223_v20, %v206_v34  ;;  %v235_v38 = vmul.f32 %v227_v25, %v205_v33  ;;  %793 = vmatprep.subr.bf16.mxu0 %v792_v30  ;;  %v351_v22 = vrot.slane %v346_v12, %v1064_v17 }
  0xca   :  { %v363_v24 = vrot.slane %v346_v12, %v1068_v21  ;;  %v355_v25 = vrot.slane %v346_v12, %v1061_v14  ;;  %v359_v26 = vrot.slane %v346_v12, %v1066_v19 }
  0xcb   :  { %v247_v40 = vpop.permute.xlu1 %246  ;;  %v245_v41 = vpop.permute.xlu0 %244  ;;  %v794_v42 = vpack.c.bf16 %v232_v36, %v188_v27  ;;  %v808_v43 = vpack.c.bf16 %v235_v38, %v191_v35  ;;  %v810_v44 = vpack.c.bf16 %v234_v37, %v190_v31  ;;  %v307_v27 = vrot.slane %v302_v15, %v1064_v17 }
  0xcc   :  { %v255_v47 = vsel %vm252_vm4, %v245_v41, %v247_v40 }
  0xcd   :  { %795 = vmatpush1.bf16.msra.mxu0 %v794_v42  ;;  %809 = vmatprep.subr.bf16.mxu1 %v808_v43  ;;  %v280_v52 = vmul.f32 %v263_v45, %v255_v47 }
  0xce   :  { %811 = vmatpush1.bf16.msra.mxu1 %v810_v44  ;;  %v390_v44 = vld [vmem:[#allocation6 + $0x20] ss:$8 sm:$0xf] }
  0xcf   :  { %v251_v50 = vpop.permute.xlu1 %250  ;;  %v249_v51 = vpop.permute.xlu0 %248  ;;  %v798_v9 = vpack.c.bf16 %v280_v52, %v1015_v4  ;;  %v315_v4 = vrot.slane %v302_v15, %v1066_v19  ;;  %v403_v52 = vrot.slane %v390_v44, %v1066_v19 }
  0xd0   :  { %v256_v53 = vsel %vm252_vm4, %v251_v50, %v245_v41  ;;  %v253_v54 = vsel %vm252_vm4, %v249_v51, %v251_v50  ;;  %v254_v55 = vsel %vm252_vm4, %v247_v40, %v249_v51  ;;  %v407_v50 = vrot.slane %v390_v44, %v1068_v21 }
  0xd1   :  { %v283_v56 = vmul.f32 %v275_v46, %v256_v53  ;;  %v281_v57 = vmul.f32 %v267_v48, %v254_v55  ;;  %v282_v58 = vmul.f32 %v271_v49, %v253_v54  ;;  %v399_v51 = vrot.slane %v390_v44, %v1061_v14 }
  0xd2   :  { %v395_v53 = vrot.slane %v390_v44, %v1064_v17 }
  0xd3   :  { %v291_v59 = vpop.permute.xlu1 %290  ;;  %v289_v60 = vpop.permute.xlu0 %288  ;;  %v796_v61 = vpack.c.bf16 %v281_v57, %v1025_v7  ;;  %v812_v62 = vpack.c.bf16 %v283_v56, %v1022_v6  ;;  %v814_v63 = vpack.c.bf16 %v282_v58, %v1012_v3  ;;  %v319_v7 = vrot.slane %v302_v15, %v1068_v21 }
  0xd4   :  { %v311_v6 = vrot.slane %v302_v15, %v1061_v14  ;;  %v299_v29 = vsel %vm296_vm6, %v289_v60, %v291_v59  ;;  %v607_v15 = vld [vmem:[%s1185_s3] sm:$0xf]  ;;  %s901_s3 = scalar_lea.vmem %s775_s9, 256 }
  0xd5   :  { %797 = vmatprep.subr.bf16.mxu0 %v796_v61  ;;  %813 = vmatprep.subr.bf16.mxu1 %v812_v62  ;;  %v324_v42 = vmul.f32 %v307_v27, %v299_v29  ;;  %p902_p10 = scmp.ne.s32.totalorder %s775_s9, %s901_s3  ;;  %p907_p12 = scmp.lt.s32.totalorder %s901_s3, %s901_s3 }
  0xd6   :  { %799 = vmatpush1.bf16.msra.mxu0 %v798_v9  ;;  %815 = vmatpush1.bf16.msra.mxu1 %v814_v63  ;;  %v420_v63 = vld [vmem:[#allocation8] sm:$0xff] }
  0xd7   :  { %v295_v10 = vpop.permute.xlu1 %294  ;;  %v293_v11 = vpop.permute.xlu0 %292  ;;  %p908_p13 = por %p907_p12, %p906_p11 }
  0xd8   :  { %v300_v18 = vsel %vm296_vm6, %v295_v10, %v289_v60  ;;  %v298_v20 = vsel %vm296_vm6, %v291_v59, %v293_v11  ;;  %v297_v28 = vsel %vm296_vm6, %v293_v11, %v295_v10 }
  0xd9   :  { %v327_v30 = vmul.f32 %v319_v7, %v300_v18  ;;  %v325_v31 = vmul.f32 %v311_v6, %v298_v20  ;;  %v326_v38 = vmul.f32 %v315_v4, %v297_v28  ;;  %p909_p0 = pnand %p908_p13, %p902_p10 }
  0xdb   :  { %v335_v16 = vpop.permute.xlu1 %334  ;;  %v333_v3 = vpop.permute.xlu0 %332 }
  0xdc   :  { %v343_v23 = vsel %vm340_vm5, %v333_v3, %v335_v16 }
  0xdd   :  { %v368_v34 = vmul.f32 %v351_v22, %v343_v23 }
  0xdf   :  { %v339_v32 = vpop.permute.xlu1 %338  ;;  %v337_v33 = vpop.permute.xlu0 %336  ;;  %v802_v49 = vpack.c.bf16 %v368_v34, %v324_v42 }
  0xe0   :  { %v344_v35 = vsel %vm340_vm5, %v339_v32, %v333_v3  ;;  %v341_v36 = vsel %vm340_vm5, %v337_v33, %v339_v32  ;;  %v342_v37 = vsel %vm340_vm5, %v335_v16, %v337_v33 }
  0xe1   :  { %v371_v39 = vmul.f32 %v363_v24, %v344_v35  ;;  %v369_v40 = vmul.f32 %v355_v25, %v342_v37  ;;  %v370_v41 = vmul.f32 %v359_v26, %v341_v36 }
  0xe3   :  { %v379_v43 = vpop.permute.xlu1 %378  ;;  %v377_v45 = vpop.permute.xlu0 %376  ;;  %v800_v46 = vpack.c.bf16 %v369_v40, %v325_v31  ;;  %v816_v47 = vpack.c.bf16 %v371_v39, %v327_v30  ;;  %v818_v48 = vpack.c.bf16 %v370_v41, %v326_v38 }
  0xe4   :  { %v387_v54 = vsel %vm384_vm7, %v377_v45, %v379_v43 }
  0xe5   :  { %801 = vmatprep.subr.bf16.mxu0 %v800_v46  ;;  %817 = vmatprep.subr.bf16.mxu1 %v816_v47  ;;  %v412_v62 = vmul.f32 %v395_v53, %v387_v54 }
  0xe6   :  { %803 = vmatpush1.bf16.msra.mxu0 %v802_v49  ;;  %819 = vmatpush1.bf16.msra.mxu1 %v818_v48 }
  0xe7   :  { %v383_v55 = vpop.permute.xlu1 %382  ;;  %v381_v56 = vpop.permute.xlu0 %380 }
  0xe8   :  { %v388_v57 = vsel %vm384_vm7, %v383_v55, %v377_v45  ;;  %v385_v58 = vsel %vm384_vm7, %v381_v56, %v383_v55  ;;  %v386_v59 = vsel %vm384_vm7, %v379_v43, %v381_v56 }
  0xe9   :  { %v415_v13 = vmul.f32 %v407_v50, %v388_v57  ;;  %v413_v60 = vmul.f32 %v399_v51, %v386_v59  ;;  %v414_v61 = vmul.f32 %v403_v52, %v385_v58 }
  0xeb   :  { %477 = vmatprep.subr.mxu0 %v413_v60  ;;  %548 = vmatprep.subr.mxu1 %v415_v13 }
  0xec   :  { %478 = vmatpush1.msra.mxu0 %v412_v62  ;;  %549 = vmatpush1.msra.mxu1 %v414_v61 }
  0xed   :  { %784 = vmatmul.mubr.msk.f32.vlgmr.msra.gmra.mrb[0].mxu0 %vm457_vm8, %v420_v63  ;;  %785 = vmatmul.mubr.msk.f32.vlgmr.msra.gmra.mrb[0].mxu1 %vm457_vm8, %v420_v63 }
  0xee   :  { %676 = vmatprep.mubr.f32.mxu0 %v941_v8  ;;  %747 = vmatprep.mubr.f32.mxu1 %v941_v8 }
 0x1c0   :  { %v527_v14 = vpop.f32.mrb[0].mxu0  ;;  %v598_v17 = vpop.f32.mrb[0].mxu1 }
 0x1c1   :  { %v529_v19 = vpop.f32.mrb[1].mxu0  ;;  %v600_v21 = vpop.f32.mrb[1].mxu1  ;;  %v603_v11 = vmax.f32 %v527_v14, 0.0  ;;  %v605_v12 = vmax.f32 %v598_v17, 0.0 }
 0x1c2   :  { %v604_v9 = vmax.f32 %v529_v19, 0.0  ;;  %v606_v10 = vmax.f32 %v600_v21, 0.0 }
 0x1c4   :  { %612 = vmatprep.subr.mxu0 %v604_v9  ;;  %683 = vmatprep.subr.mxu1 %v606_v10 }
 0x1c5   :  { %613 = vmatpush1.msra.mxu0 %v603_v11  ;;  %684 = vmatpush1.msra.mxu1 %v605_v12 }
 0x1c6   :  { %786 = vmatmul.mubr.msk.f32.vlgmr.msra.gmra.mrb[2].mxu0 %vm608_vm9, %v607_v15  ;;  %787 = vmatmul.mubr.msk.f32.vlgmr.msra.gmra.mrb[2].mxu1 %vm608_vm9, %v607_v15 }
 0x299   :  { %v678_v8 = vpop.f32.mrb[2].mxu0  ;;  %v749_v7 = vpop.f32.mrb[2].mxu1 }
 0x29a   :  { %v754_v6 = vadd.f32 %v678_v8, %v1007_v1  ;;  %v756_v16 = vadd.f32 %v749_v7, %v1005_v0  ;;  %v680_v3 = vpop.f32.mrb[3].mxu0  ;;  %v751_v18 = vpop.f32.mrb[3].mxu1 }
 0x29b   :  { %v755_v4 = vadd.f32 %v680_v3, %v1017_v5  ;;  %v757_v20 = vadd.f32 %v751_v18, %v1009_v2 }
 0x29d   :  { %v762_v22 = vcombine.low %v754_v6, %v755_v4  ;;  %v763_v23 = vcombine.low %v756_v16, %v757_v20 }
 0x29f   :  { %766 = vst [vmem:[#allocation9] sm:$0xff] %v762_v22  ;;  %767 = vst [vmem:[#allocation9 + $0x8] sm:$0xff] %v763_v23 }
 0x2a0   :  { %912 = shalt.err (!%p909_p0)
}
 0x2a1   :  { %s913_s12 = scalar_lea.hbm %s1186_s4, 256 }
 0x2a2   :  { %p914_p1 = scmp.ne.s32.totalorder %s1186_s4, %s913_s12  ;;  %p917_p2 = scmp.lt.u32.totalorder %s913_s12, %s1186_s4 }
 0x2a4   :  { %p919_p3 = pnand %p917_p2, %p914_p1 }
 0x2a6   :  { %922 = shalt.err (!%p919_p3)
}
 0x2a7   :  { %777 = dma.vmem_to_hbm [thread:$0]  %s775_s9, 256, %s1186_s4, [#allocation5]  }
 0x2a8   :  { %927 = dma.done.wait [#allocation5], 256  }
 0x2a9   :  { %928 = vsyncadd [#allocation5], 4294967040 }
 0x2aa   :  { %781 = vsyncpa [#allocation4], 1 }
 0x2ab   :  { %782 = vsyncpa [#allocation7], 1 }
 0x2ac   :  { %783 = vsyncpa [#allocation5], 1 }

</bundles_post_ra>
